<compile_context>
chip_gen: v7x
topology: tpu7x:2x2x1
jax: 0.10.0
libtpu: 0.0.40
codegen_flags: <defaults>
</compile_context>

<pallas_src>
import functools
import math

import jax
import jax.numpy as jnp
from jax.experimental import pallas as pl
from jax.experimental.pallas import tpu as pltpu


def make_pe_table(d_model: int, max_len: int = 5000, dtype=jnp.float32):
    """Deterministic sin/cos positional-encoding buffer, shape (max_len, d_model)."""
    position = jnp.arange(0, max_len, dtype=jnp.float32)[:, None]            # (L, 1)
    div_term = jnp.exp(
        jnp.arange(0, d_model, 2, dtype=jnp.float32) * (-math.log(10000.0) / d_model)
    )                                                                         # (ceil(D/2),)
    ang = position * div_term                                                 # (L, ceil(D/2))
    # interleave: even columns <- sin, odd columns <- cos; slice handles odd D
    pe = jnp.stack([jnp.sin(ang), jnp.cos(ang)], axis=-1).reshape(max_len, -1)
    pe = pe[:, :d_model]
    return pe.astype(dtype)


def _pe_add_kernel_sliced(x_ref, pe_ref, o_ref, *, batch: int, d_model: int):
    # x_ref / o_ref: (tile_S, B*D); pe_ref: (tile_S, D), D % 128 == 0 here.
    # Unrolled per-batch static slices: each add is a full-width lane-aligned
    # (tile_S, D) vadd stored straight to its output slice — no (tile_S, B*D)
    # replicated temp in VMEM, no extra vst/vld per result vreg.
    pe = pe_ref[...]
    for b in range(batch):
        sl = slice(b * d_model, (b + 1) * d_model)
        o_ref[:, sl] = x_ref[:, sl] + pe


def _pe_add_kernel_broadcast(x_ref, pe_ref, o_ref, *, batch: int):
    # Fallback for lane-unaligned D: per-batch slices would be masked stores
    # anyway, so replicate pe across lanes and do one full-width add.
    o_ref[...] = x_ref[...] + jnp.tile(pe_ref[...], (1, batch))


def _round_up(x: int, m: int) -> int:
    return ((x + m - 1) // m) * m


def _choose_tile_s(seq_len: int, row_bytes: int, itemsize: int,
                   target_bytes: int = 2 << 20) -> int:
    """Pick a seq-tile so each x block is ~2 MiB, sublane-aligned for the dtype."""
    sub_mult = max(8, 32 // max(itemsize, 1))       # 8 (f32), 16 (bf16), 32 (int8/fp8)
    t = max(target_bytes // max(row_bytes, 1), 1)
    t = max((t // sub_mult) * sub_mult, sub_mult)
    # Keep >= 2 grid steps when S allows, so the "parallel" seq axis gives
    # v7x's second TensorCore work instead of collapsing to a (1,) grid.
    half = _round_up(pl.cdiv(seq_len, 2), sub_mult)
    if half < seq_len:
        t = min(t, half)
    return min(t, seq_len)


@jax.jit
def positional_encoding(x: jax.Array, pe_full: jax.Array) -> jax.Array:
    """x: (S, B, D); pe_full: (max_len, D). Returns x + pe[:S] broadcast over B."""
    S, B, D = x.shape
    # TODO(synk): in a long-lived model, build the table directly in the model
    # dtype / cache this slice per (S, dtype) so the tiny op isn't re-emitted.
    pe = pe_full[:S]
    if pe.dtype != x.dtype:
        pe = pe.astype(x.dtype)                      # no promotion, no double pe traffic for bf16
    x2 = x.reshape(S, B * D)                         # free view: 2-D lane-dense kernel refs

    itemsize = jnp.dtype(x.dtype).itemsize
    tile_s = _choose_tile_s(S, B * D * itemsize, itemsize)
    grid = (pl.cdiv(S, tile_s),)

    if D % 128 == 0 or B == 1:
        kernel = functools.partial(_pe_add_kernel_sliced, batch=B, d_model=D)
    else:
        kernel = functools.partial(_pe_add_kernel_broadcast, batch=B)

    out2 = pl.pallas_call(
        kernel,
        out_shape=jax.ShapeDtypeStruct((S, B * D), x.dtype),
        grid=grid,
        in_specs=[
            pl.BlockSpec((tile_s, B * D), lambda i: (i, 0)),
            pl.BlockSpec((tile_s, D), lambda i: (i, 0)),
        ],
        out_specs=pl.BlockSpec((tile_s, B * D), lambda i: (i, 0)),
        # Same-shape elementwise add: let XLA reuse the activation buffer.
        input_output_aliases={0: 0},
        compiler_params=pltpu.CompilerParams(
            dimension_semantics=("parallel",),        # v7x: shard seq tiles across its 2 TCs
            vmem_limit_bytes=32 << 20,                # explicit: > v5e's 16 MiB default, <= v7x's budget
        ),
        cost_estimate=pl.CostEstimate(
            flops=S * B * D,
            transcendentals=0,
            bytes_accessed=(2 * S * B * D + S * D) * itemsize,
        ),
    )(x2, pe)
    return out2.reshape(S, B, D)


if __name__ == "__main__":
    key = jax.random.PRNGKey(0)
    max_len = 5000

    def _check(S, B, D, dtype=jnp.float32, atol=1e-5):
        k = jax.random.fold_in(key, S * 1000 + B * 100 + D)
        x = jax.random.normal(k, (S, B, D), dtype=dtype)
        pe_full = make_pe_table(D, max_len=max_len, dtype=dtype)
        out = jax.block_until_ready(positional_encoding(x, pe_full))
        ref = x + pe_full[:S, :].astype(dtype)[:, None, :]
        assert out.shape == (S, B, D) and out.dtype == x.dtype
        assert jnp.allclose(out.astype(jnp.float32), ref.astype(jnp.float32), atol=atol), \
            f"mismatch vs reference at {(S, B, D, dtype)}"

    # (seq, batch, d_model) — small shape, lane-unaligned D -> broadcast path, single seq tile.
    _check(8, 2, 32)
    # Lane-aligned D -> per-batch slice path; 2 seq tiles -> pipelined, megacore-shardable grid.
    _check(512, 4, 256)
    # bf16 run: same tiling logic with 16-row sublane packing.
    _check(512, 4, 256, dtype=jnp.bfloat16, atol=2e-2)

    print("KERNEL_OK")
</pallas_src>

<mosaic_0001>
module attributes {stable_mosaic.version = 11 : i64} {
  func.func @_pe_add_kernel_broadcast(%arg0: i32, %arg1: memref<8x64xf32, #tpu.memory_space<vmem>>, %arg2: memref<8x32xf32, #tpu.memory_space<vmem>>, %arg3: memref<8x64xf32, #tpu.memory_space<vmem>>) attributes {dimension_semantics = [#tpu.dimension_semantics<parallel>], iteration_bounds = array<i64: 1>, scalar_prefetch = 0 : i64, scratch_operands = 0 : i64, tpu.core_type = #tpu.core_type<tc>, window_params = [{transform_indices = @transform_0, window_bounds = array<i64: 8, 64>}, {transform_indices = @transform_1, window_bounds = array<i64: 8, 32>}, {transform_indices = @transform_2, window_bounds = array<i64: 8, 64>}]} {
    %c0 = arith.constant 0 : index
    %c0_0 = arith.constant 0 : index
    %0 = vector.load %arg1[%c0, %c0_0] : memref<8x64xf32, #tpu.memory_space<vmem>>, vector<8x64xf32>
    %c0_1 = arith.constant 0 : index
    %c0_2 = arith.constant 0 : index
    %1 = vector.load %arg2[%c0_1, %c0_2] : memref<8x32xf32, #tpu.memory_space<vmem>>, vector<8x32xf32>
    %2 = tpu.concatenate %1, %1 in 1 : vector<8x32xf32>, vector<8x32xf32> -> vector<8x64xf32>
    %3 = arith.addf %0, %2 : vector<8x64xf32>
    %c0_3 = arith.constant 0 : index
    %c0_4 = arith.constant 0 : index
    %4 = vector.load %arg3[%c0_3, %c0_4] : memref<8x64xf32, #tpu.memory_space<vmem>>, vector<8x64xf32>
    tpu.vector_store %arg3[%c0_3, %c0_4], %3 {strides = array<i32>} : memref<8x64xf32, #tpu.memory_space<vmem>>, vector<8x64xf32>,
    return
  }
  func.func @transform_0(%arg0: i32) -> (i32, i32) {
    %c0_i32 = arith.constant 0 : i32
    %c0_i32_0 = arith.constant 0 : i32
    return %arg0, %c0_i32 : i32, i32
  }
  func.func @transform_1(%arg0: i32) -> (i32, i32) {
    %c0_i32 = arith.constant 0 : i32
    %c0_i32_0 = arith.constant 0 : i32
    return %arg0, %c0_i32 : i32, i32
  }
  func.func @transform_2(%arg0: i32) -> (i32, i32) {
    %c0_i32 = arith.constant 0 : i32
    %c0_i32_0 = arith.constant 0 : i32
    return %arg0, %c0_i32 : i32, i32
  }
}

</mosaic_0001>

<bundles_post_ra>
// kernel: positional_encoding.1
= control target key start
LH: loop header
LB: loop body
LE: loop exit
PB: predicated region body
PF: predicated region fallthrough
CT: control target
= control target key end

     0   :  { %s27_s11 = smov 32   ;;  %vm17_vm0 = vcmask 261120   ;;  %vm20_vm1 = vcmask 523264   ;;  %s52_s1 = inlined_call_operand.vmem [shape: f32[8,32], index: 1, kind: input, shape index: {}]   ;;  %s53_s0 = inlined_call_operand.vmem [shape: f32[8,64], index: 0, kind: input, shape index: {}, may-alias: {0,2}]   ;;  %s54_s2 = inlined_call_operand.vmem [shape: f32[8,64], index: 2, kind: output, shape index: {}, may-alias: {0,2}]  }
   0x1   :  { %v12_v0 = vld [vmem:[%s52_s1] sm:$0xff] }
   0x2   :  { %14 = vrot.lane.b32.xlu0 %v12_v0, %s27_s11  ;;  %v11_v1 = vld [vmem:[%s53_s0] sm:$0xff] }
  0x74   :  { %v15_v2 = vpop.permute.xlu0 %14 }
  0x75   :  { %v18_v3 = vsel %vm17_vm0, %v12_v0, %v15_v2 }
  0x76   :  { %v19_v4 = vadd.f32 %v18_v3, %v11_v1 }
  0x78   :  { %21 = vst.msk [vmem:[%s54_s2] sm:$0xff] %vm20_vm1, %v19_v4 }

</bundles_post_ra>
